<compile_context>
chip_gen: v7x
topology: tpu7x:2x2x1
jax: 0.10.0
libtpu: 0.0.40
codegen_flags: <defaults>
</compile_context>

<pallas_src>
import jax
import jax.numpy as jnp
from jax.experimental import pallas as pl
from jax.experimental.pallas import tpu as pltpu


# ---------------------------------------------------------------------------
# Fused ConvGRU gating kernel.
#
# Layout: x2, h2, out are channel-major 2-D slabs (C, N) where N = B*prod(S)
# is the flattened batch*position axis (mapped to TPU lanes).  Pointwise
# (1x1-conv) projections are therefore (C_out, C_in) @ (C_in, TN) matmuls with
# lane-dense outputs.
# ---------------------------------------------------------------------------
def _conv_gru_fusion_kernel(x_ref, h_ref, wp_ref, bp_ref, wx_ref, bx_ref,
                            wh_ref, bh_ref, o_ref):
    x = x_ref[...]                                            # (Cx, TN)
    h = h_ref[...]                                            # (Ch, TN)

    # Project the conditioning stream to the main stream's channel count
    # (used as the GRU "hidden state").
    hp = jnp.dot(wp_ref[...], h, preferred_element_type=jnp.float32) + bp_ref[...]

    def gate(w_ref, b_ref, idx, v):
        return jnp.dot(w_ref[idx], v, preferred_element_type=jnp.float32) + b_ref[idx]

    r = jax.nn.sigmoid(gate(wx_ref, bx_ref, 0, x) + gate(wh_ref, bh_ref, 0, hp))
    z = jax.nn.sigmoid(gate(wx_ref, bx_ref, 1, x) + gate(wh_ref, bh_ref, 1, hp))
    n = jnp.tanh(gate(wx_ref, bx_ref, 2, x) + r * gate(wh_ref, bh_ref, 2, hp))

    o_ref[...] = ((1.0 - z) * n + z * hp).astype(o_ref.dtype)


def _gru_gate_pallas(x2, h2, params, *, tn=512):
    """Run the fused gating kernel on channel-major slabs x2:(Cx,N), h2:(Ch,N)."""
    wp, bp, wx, bx, wh, bh = params
    cx, n = x2.shape
    ch = h2.shape[0]

    # Tile the flattened-position (lane) axis in lane-dense chunks; small
    # inputs go through as a single full block (always a legal block shape).
    if n > tn:
        pad = (-n) % tn
        if pad:
            x2 = jnp.pad(x2, ((0, 0), (0, pad)))
            h2 = jnp.pad(h2, ((0, 0), (0, pad)))
        n_pad = n + pad
        block_n = tn
    else:
        n_pad = n
        block_n = n
    grid = (n_pad // block_n,)

    out = pl.pallas_call(
        _conv_gru_fusion_kernel,
        grid=grid,
        in_specs=[
            pl.BlockSpec((cx, block_n), lambda i: (0, i)),
            pl.BlockSpec((ch, block_n), lambda i: (0, i)),
            pl.BlockSpec(wp.shape, lambda i: (0, 0)),
            pl.BlockSpec(bp.shape, lambda i: (0, 0)),
            pl.BlockSpec(wx.shape, lambda i: (0, 0, 0)),
            pl.BlockSpec(bx.shape, lambda i: (0, 0, 0)),
            pl.BlockSpec(wh.shape, lambda i: (0, 0, 0)),
            pl.BlockSpec(bh.shape, lambda i: (0, 0, 0)),
        ],
        out_specs=pl.BlockSpec((cx, block_n), lambda i: (0, i)),
        out_shape=jax.ShapeDtypeStruct((cx, n_pad), x2.dtype),
        compiler_params=pltpu.CompilerParams(dimension_semantics=("parallel",)),
    )(x2, h2, wp, bp, wx, bx, wh, bh)
    return out[:, :n]


def _gru_gate_ref(x2, h2, params):
    """Pure-JAX reference of the exact same math (for correctness checking)."""
    wp, bp, wx, bx, wh, bh = params
    hp = wp @ h2 + bp
    r = jax.nn.sigmoid(wx[0] @ x2 + bx[0] + wh[0] @ hp + bh[0])
    z = jax.nn.sigmoid(wx[1] @ x2 + bx[1] + wh[1] @ hp + bh[1])
    n = jnp.tanh(wx[2] @ x2 + bx[2] + r * (wh[2] @ hp + bh[2]))
    return (1.0 - z) * n + z * hp


# ---------------------------------------------------------------------------
# Layout plumbing (wrapper-side, metadata / cheap gathers only).
# ---------------------------------------------------------------------------
def _nearest_resize(h, out_spatial):
    """Nearest-neighbour resize of h's spatial dims (dims 2:) to out_spatial."""
    for k, s_out in enumerate(out_spatial):
        ax = 2 + k
        s_in = h.shape[ax]
        if s_in != s_out:
            idx = (jnp.arange(s_out) * s_in) // s_out
            h = jnp.take(h, idx, axis=ax)
    return h


def _to_channel_major(x):
    # (B, C, *S) -> (C, B*prod(S))   lane-dense slab for the kernel
    c = x.shape[1]
    perm = (1, 0) + tuple(range(2, x.ndim))
    return jnp.transpose(x, perm).reshape(c, -1)


def _from_channel_major(x2, orig_shape):
    b, c = orig_shape[:2]
    x = x2.reshape((c, b) + tuple(orig_shape[2:]))
    perm = (1, 0) + tuple(range(2, len(orig_shape)))
    return jnp.transpose(x, perm)


# ---------------------------------------------------------------------------
# Modules
# ---------------------------------------------------------------------------
class ConvGRUFusionCell:
    """GRU-style gated cross-modal fusion cell.

    x : main stream          (B, in_chan,  *S_x)
    h : conditioning stream  (B, hid_chan, *S_h)  -> aligned to *S_x, used as
                                                     the GRU "hidden state".
    returns                  (B, in_chan,  *S_x)
    """

    def __init__(self, key, in_chan, hid_chan, kernel_size, bidirectional, is2d):
        self.in_chan = in_chan
        self.hid_chan = hid_chan
        self.kernel_size = kernel_size      # TODO(synk): k>1 spatial conv not implemented (pointwise gates only).
        self.bidirectional = bidirectional  # TODO(synk): bidirectional scan not implemented (cell has no recurrence).
        self.is2d = is2d

        ks = jax.random.split(key, 3)
        s = 0.5 / float(max(in_chan, hid_chan)) ** 0.5
        self.wp = jax.random.normal(ks[0], (in_chan, hid_chan), jnp.float32) * s
        self.bp = jnp.zeros((in_chan, 1), jnp.float32)
        self.wx = jax.random.normal(ks[1], (3, in_chan, in_chan), jnp.float32) * s
        self.bx = jnp.zeros((3, in_chan, 1), jnp.float32)
        self.wh = jax.random.normal(ks[2], (3, in_chan, in_chan), jnp.float32) * s
        self.bh = jnp.zeros((3, in_chan, 1), jnp.float32)

    @property
    def params(self):
        return (self.wp, self.bp, self.wx, self.bx, self.wh, self.bh)

    def _prep(self, x, h):
        h = _nearest_resize(h, x.shape[2:])
        return _to_channel_major(x), _to_channel_major(h)

    def __call__(self, x, h):
        x2, h2 = self._prep(x, h)
        o2 = _gru_gate_pallas(x2, h2, self.params)
        return _from_channel_major(o2, x.shape)

    def reference(self, x, h):
        x2, h2 = self._prep(x, h)
        o2 = _gru_gate_ref(x2, h2, self.params)
        return _from_channel_major(o2, x.shape)


class FusionBasemodule:
    def __init__(self, ain_chan, vin_chan, kernel_size, video_fusion, is2d):
        self.ain_chan = ain_chan
        self.vin_chan = vin_chan
        self.kernel_size = kernel_size
        self.video_fusion = video_fusion
        self.is2d = is2d

    def forward(self, audio, video):
        raise NotImplementedError

    def wrangle_dims(self, audio, video):
        # Metadata-only, exactly like torch.unsqueeze (a view): NO Pallas copy.
        T1 = audio.shape[-(len(audio.shape) // 2):]
        T2 = video.shape[-(len(video.shape) // 2):]
        self.x = len(T1) > len(T2)
        self.y = len(T2) > len(T1)
        video = video[..., None] if self.x else video
        audio = audio[..., None] if self.y else audio
        return audio, video

    def unwrangle_dims(self, audio, video):
        video = jnp.squeeze(video, -1) if self.x else video
        audio = jnp.squeeze(audio, -1) if self.y else audio
        return audio, video


class GRUFusion(FusionBasemodule):
    def __init__(self, key, ain_chan, vin_chan, kernel_size,
                 video_fusion=True, is2d=True, bidirectional=True):
        super().__init__(ain_chan, vin_chan, kernel_size, video_fusion, is2d)
        self.bidirectional = bidirectional
        kv, ka = jax.random.split(key)
        if video_fusion:
            self.video_lstm = ConvGRUFusionCell(kv, vin_chan, ain_chan,
                                                kernel_size, bidirectional, is2d)
        self.audio_lstm = ConvGRUFusionCell(ka, ain_chan, vin_chan,
                                            kernel_size, bidirectional, is2d)

    def forward(self, audio, video):
        audio, video = self.wrangle_dims(audio, video)
        if self.video_fusion:
            video_fused = self.video_lstm(video, audio)
        else:
            video_fused = video
        audio_fused = self.audio_lstm(audio, video)
        audio_fused, video_fused = self.unwrangle_dims(audio_fused, video_fused)
        return audio_fused, video_fused

    def reference(self, audio, video):
        audio, video = self.wrangle_dims(audio, video)
        if self.video_fusion:
            video_fused = self.video_lstm.reference(video, audio)
        else:
            video_fused = video
        audio_fused = self.audio_lstm.reference(audio, video)
        return self.unwrangle_dims(audio_fused, video_fused)


if __name__ == "__main__":
    key = jax.random.PRNGKey(0)
    kp, ka, kv = jax.random.split(key, 3)

    # audio: (B, ain_chan, T, F) 2D feature map; video: (B, vin_chan, Tv).
    B, Ca, T, F = 2, 4, 16, 16
    Cv, Tv = 4, 16
    audio = jax.random.normal(ka, (B, Ca, T, F), dtype=jnp.float32)
    video = jax.random.normal(kv, (B, Cv, Tv), dtype=jnp.float32)

    mod = GRUFusion(kp, ain_chan=Ca, vin_chan=Cv, kernel_size=3,
                    video_fusion=True, is2d=True, bidirectional=True)

    audio_fused, video_fused = mod.forward(audio, video)
    jax.block_until_ready((audio_fused, video_fused))

    # Shape semantics: fused outputs match the unwrangled input shapes.
    assert audio_fused.shape == (B, Ca, T, F), audio_fused.shape
    assert video_fused.shape == (B, Cv, Tv), video_fused.shape
    assert mod.x is True and mod.y is False

    # Value semantics: Pallas fused kernel matches the pure-JAX reference.
    a_ref, v_ref = mod.reference(audio, video)
    assert jnp.allclose(audio_fused, a_ref, rtol=1e-3, atol=1e-3)
    assert jnp.allclose(video_fused, v_ref, rtol=1e-3, atol=1e-3)
    assert bool(jnp.all(jnp.isfinite(audio_fused)))
    assert bool(jnp.all(jnp.isfinite(video_fused)))

    print("KERNEL_OK")
</pallas_src>

<mosaic_0001>
module attributes {stable_mosaic.version = 11 : i64} {
  func.func @_conv_gru_fusion_kernel(%arg0: i32, %arg1: memref<4x32xf32, #tpu.memory_space<vmem>>, %arg2: memref<4x32xf32, #tpu.memory_space<vmem>>, %arg3: memref<4x4xf32, #tpu.memory_space<vmem>>, %arg4: memref<4x1xf32, #tpu.memory_space<vmem>>, %arg5: memref<3x4x4xf32, #tpu.memory_space<vmem>>, %arg6: memref<3x4x1xf32, #tpu.memory_space<vmem>>, %arg7: memref<3x4x4xf32, #tpu.memory_space<vmem>>, %arg8: memref<3x4x1xf32, #tpu.memory_space<vmem>>, %arg9: memref<4x32xf32, #tpu.memory_space<vmem>>) attributes {dimension_semantics = [#tpu.dimension_semantics<parallel>], iteration_bounds = array<i64: 1>, scalar_prefetch = 0 : i64, scratch_operands = 0 : i64, tpu.core_type = #tpu.core_type<tc>, window_params = [{transform_indices = @transform_0, window_bounds = array<i64: 4, 32>}, {transform_indices = @transform_1, window_bounds = array<i64: 4, 32>}, {pipeline_mode = #tpu.pipeline_mode<synchronous>, transform_indices = @transform_2, window_bounds = array<i64: 4, 4>}, {pipeline_mode = #tpu.pipeline_mode<synchronous>, transform_indices = @transform_3, window_bounds = array<i64: 4, 1>}, {pipeline_mode = #tpu.pipeline_mode<synchronous>, transform_indices = @transform_4, window_bounds = array<i64: 3, 4, 4>}, {pipeline_mode = #tpu.pipeline_mode<synchronous>, transform_indices = @transform_5, window_bounds = array<i64: 3, 4, 1>}, {pipeline_mode = #tpu.pipeline_mode<synchronous>, transform_indices = @transform_6, window_bounds = array<i64: 3, 4, 4>}, {pipeline_mode = #tpu.pipeline_mode<synchronous>, transform_indices = @transform_7, window_bounds = array<i64: 3, 4, 1>}, {transform_indices = @transform_8, window_bounds = array<i64: 4, 32>}]} {
    %c0 = arith.constant 0 : index
    %c0_0 = arith.constant 0 : index
    %0 = vector.load %arg1[%c0, %c0_0] : memref<4x32xf32, #tpu.memory_space<vmem>>, vector<4x32xf32>
    %c0_1 = arith.constant 0 : index
    %c0_2 = arith.constant 0 : index
    %1 = vector.load %arg2[%c0_1, %c0_2] : memref<4x32xf32, #tpu.memory_space<vmem>>, vector<4x32xf32>
    %c0_3 = arith.constant 0 : index
    %c0_4 = arith.constant 0 : index
    %2 = vector.load %arg3[%c0_3, %c0_4] : memref<4x4xf32, #tpu.memory_space<vmem>>, vector<4x4xf32>
    %cst = arith.constant dense<0.000000e+00> : vector<4x32xf32>
    %3 = tpu.matmul %2, %1, %cst {dimension_numbers = #tpu.dot_dimension_numbers<[1], [0], [0], [1], [0, 0, 1, 1], [], []>} : vector<4x4xf32>, vector<4x32xf32>, vector<4x32xf32> -> vector<4x32xf32>
    %c0_5 = arith.constant 0 : index
    %c0_6 = arith.constant 0 : index
    %4 = vector.load %arg4[%c0_5, %c0_6] : memref<4x1xf32, #tpu.memory_space<vmem>>, vector<4x1xf32>
    %5 = vector.broadcast %4 : vector<4x1xf32> to vector<4x32xf32>
    %6 = arith.addf %3, %5 : vector<4x32xf32>
    %c0_7 = arith.constant 0 : index
    %c0_8 = arith.constant 0 : index
    %c0_9 = arith.constant 0 : index
    %7 = vector.load %arg5[%c0_7, %c0_8, %c0_9] : memref<3x4x4xf32, #tpu.memory_space<vmem>>, vector<1x4x4xf32>
    %8 = vector.shape_cast %7 : vector<1x4x4xf32> to vector<4x4xf32>
    %cst_10 = arith.constant dense<0.000000e+00> : vector<4x32xf32>
    %9 = tpu.matmul %8, %0, %cst_10 {dimension_numbers = #tpu.dot_dimension_numbers<[1], [0], [0], [1], [0, 0, 1, 1], [], []>} : vector<4x4xf32>, vector<4x32xf32>, vector<4x32xf32> -> vector<4x32xf32>
    %c0_11 = arith.constant 0 : index
    %c0_12 = arith.constant 0 : index
    %c0_13 = arith.constant 0 : index
    %10 = vector.load %arg6[%c0_11, %c0_12, %c0_13] : memref<3x4x1xf32, #tpu.memory_space<vmem>>, vector<1x4x1xf32>
    %11 = vector.shape_cast %10 : vector<1x4x1xf32> to vector<4x1xf32>
    %12 = vector.broadcast %11 : vector<4x1xf32> to vector<4x32xf32>
    %13 = arith.addf %9, %12 : vector<4x32xf32>
    %c0_14 = arith.constant 0 : index
    %c0_15 = arith.constant 0 : index
    %c0_16 = arith.constant 0 : index
    %14 = vector.load %arg7[%c0_14, %c0_15, %c0_16] : memref<3x4x4xf32, #tpu.memory_space<vmem>>, vector<1x4x4xf32>
    %15 = vector.shape_cast %14 : vector<1x4x4xf32> to vector<4x4xf32>
    %cst_17 = arith.constant dense<0.000000e+00> : vector<4x32xf32>
    %16 = tpu.matmul %15, %6, %cst_17 {dimension_numbers = #tpu.dot_dimension_numbers<[1], [0], [0], [1], [0, 0, 1, 1], [], []>} : vector<4x4xf32>, vector<4x32xf32>, vector<4x32xf32> -> vector<4x32xf32>
    %c0_18 = arith.constant 0 : index
    %c0_19 = arith.constant 0 : index
    %c0_20 = arith.constant 0 : index
    %17 = vector.load %arg8[%c0_18, %c0_19, %c0_20] : memref<3x4x1xf32, #tpu.memory_space<vmem>>, vector<1x4x1xf32>
    %18 = vector.shape_cast %17 : vector<1x4x1xf32> to vector<4x1xf32>
    %19 = vector.broadcast %18 : vector<4x1xf32> to vector<4x32xf32>
    %20 = arith.addf %16, %19 : vector<4x32xf32>
    %21 = arith.addf %13, %20 : vector<4x32xf32>
    %22 = arith.negf %21 : vector<4x32xf32>
    %23 = math.exp %22 : vector<4x32xf32>
    %cst_21 = arith.constant 1.000000e+00 : f32
    %24 = vector.broadcast %cst_21 : f32 to vector<4x32xf32>
    %25 = arith.addf %24, %23 : vector<4x32xf32>
    %26 = arith.divf %24, %25 : vector<4x32xf32>
    %c1 = arith.constant 1 : index
    %c0_22 = arith.constant 0 : index
    %c0_23 = arith.constant 0 : index
    %27 = vector.load %arg5[%c1, %c0_22, %c0_23] : memref<3x4x4xf32, #tpu.memory_space<vmem>>, vector<1x4x4xf32>
    %28 = vector.shape_cast %27 : vector<1x4x4xf32> to vector<4x4xf32>
    %cst_24 = arith.constant dense<0.000000e+00> : vector<4x32xf32>
    %29 = tpu.matmul %28, %0, %cst_24 {dimension_numbers = #tpu.dot_dimension_numbers<[1], [0], [0], [1], [0, 0, 1, 1], [], []>} : vector<4x4xf32>, vector<4x32xf32>, vector<4x32xf32> -> vector<4x32xf32>
    %c1_25 = arith.constant 1 : index
    %c0_26 = arith.constant 0 : index
    %c0_27 = arith.constant 0 : index
    %30 = vector.load %arg6[%c1_25, %c0_26, %c0_27] : memref<3x4x1xf32, #tpu.memory_space<vmem>>, vector<1x4x1xf32>
    %31 = vector.shape_cast %30 : vector<1x4x1xf32> to vector<4x1xf32>
    %32 = vector.broadcast %31 : vector<4x1xf32> to vector<4x32xf32>
    %33 = arith.addf %29, %32 : vector<4x32xf32>
    %c1_28 = arith.constant 1 : index
    %c0_29 = arith.constant 0 : index
    %c0_30 = arith.constant 0 : index
    %34 = vector.load %arg7[%c1_28, %c0_29, %c0_30] : memref<3x4x4xf32, #tpu.memory_space<vmem>>, vector<1x4x4xf32>
    %35 = vector.shape_cast %34 : vector<1x4x4xf32> to vector<4x4xf32>
    %cst_31 = arith.constant dense<0.000000e+00> : vector<4x32xf32>
    %36 = tpu.matmul %35, %6, %cst_31 {dimension_numbers = #tpu.dot_dimension_numbers<[1], [0], [0], [1], [0, 0, 1, 1], [], []>} : vector<4x4xf32>, vector<4x32xf32>, vector<4x32xf32> -> vector<4x32xf32>
    %c1_32 = arith.constant 1 : index
    %c0_33 = arith.constant 0 : index
    %c0_34 = arith.constant 0 : index
    %37 = vector.load %arg8[%c1_32, %c0_33, %c0_34] : memref<3x4x1xf32, #tpu.memory_space<vmem>>, vector<1x4x1xf32>
    %38 = vector.shape_cast %37 : vector<1x4x1xf32> to vector<4x1xf32>
    %39 = vector.broadcast %38 : vector<4x1xf32> to vector<4x32xf32>
    %40 = arith.addf %36, %39 : vector<4x32xf32>
    %41 = arith.addf %33, %40 : vector<4x32xf32>
    %42 = arith.negf %41 : vector<4x32xf32>
    %43 = math.exp %42 : vector<4x32xf32>
    %cst_35 = arith.constant 1.000000e+00 : f32
    %44 = vector.broadcast %cst_35 : f32 to vector<4x32xf32>
    %45 = arith.addf %44, %43 : vector<4x32xf32>
    %46 = arith.divf %44, %45 : vector<4x32xf32>
    %c2 = arith.constant 2 : index
    %c0_36 = arith.constant 0 : index
    %c0_37 = arith.constant 0 : index
    %47 = vector.load %arg5[%c2, %c0_36, %c0_37] : memref<3x4x4xf32, #tpu.memory_space<vmem>>, vector<1x4x4xf32>
    %48 = vector.shape_cast %47 : vector<1x4x4xf32> to vector<4x4xf32>
    %cst_38 = arith.constant dense<0.000000e+00> : vector<4x32xf32>
    %49 = tpu.matmul %48, %0, %cst_38 {dimension_numbers = #tpu.dot_dimension_numbers<[1], [0], [0], [1], [0, 0, 1, 1], [], []>} : vector<4x4xf32>, vector<4x32xf32>, vector<4x32xf32> -> vector<4x32xf32>
    %c2_39 = arith.constant 2 : index
    %c0_40 = arith.constant 0 : index
    %c0_41 = arith.constant 0 : index
    %50 = vector.load %arg6[%c2_39, %c0_40, %c0_41] : memref<3x4x1xf32, #tpu.memory_space<vmem>>, vector<1x4x1xf32>
    %51 = vector.shape_cast %50 : vector<1x4x1xf32> to vector<4x1xf32>
    %52 = vector.broadcast %51 : vector<4x1xf32> to vector<4x32xf32>
    %53 = arith.addf %49, %52 : vector<4x32xf32>
    %c2_42 = arith.constant 2 : index
    %c0_43 = arith.constant 0 : index
    %c0_44 = arith.constant 0 : index
    %54 = vector.load %arg7[%c2_42, %c0_43, %c0_44] : memref<3x4x4xf32, #tpu.memory_space<vmem>>, vector<1x4x4xf32>
    %55 = vector.shape_cast %54 : vector<1x4x4xf32> to vector<4x4xf32>
    %cst_45 = arith.constant dense<0.000000e+00> : vector<4x32xf32>
    %56 = tpu.matmul %55, %6, %cst_45 {dimension_numbers = #tpu.dot_dimension_numbers<[1], [0], [0], [1], [0, 0, 1, 1], [], []>} : vector<4x4xf32>, vector<4x32xf32>, vector<4x32xf32> -> vector<4x32xf32>
    %c2_46 = arith.constant 2 : index
    %c0_47 = arith.constant 0 : index
    %c0_48 = arith.constant 0 : index
    %57 = vector.load %arg8[%c2_46, %c0_47, %c0_48] : memref<3x4x1xf32, #tpu.memory_space<vmem>>, vector<1x4x1xf32>
    %58 = vector.shape_cast %57 : vector<1x4x1xf32> to vector<4x1xf32>
    %59 = vector.broadcast %58 : vector<4x1xf32> to vector<4x32xf32>
    %60 = arith.addf %56, %59 : vector<4x32xf32>
    %61 = arith.mulf %26, %60 : vector<4x32xf32>
    %62 = arith.addf %53, %61 : vector<4x32xf32>
    %63 = math.tanh %62 : vector<4x32xf32>
    %cst_49 = arith.constant 1.000000e+00 : f32
    %64 = vector.broadcast %cst_49 : f32 to vector<4x32xf32>
    %65 = arith.subf %64, %46 : vector<4x32xf32>
    %66 = arith.mulf %65, %63 : vector<4x32xf32>
    %67 = arith.mulf %46, %6 : vector<4x32xf32>
    %68 = arith.addf %66, %67 : vector<4x32xf32>
    %c0_50 = arith.constant 0 : index
    %c0_51 = arith.constant 0 : index
    %69 = vector.load %arg9[%c0_50, %c0_51] : memref<4x32xf32, #tpu.memory_space<vmem>>, vector<4x32xf32>
    tpu.vector_store %arg9[%c0_50, %c0_51], %68 {strides = array<i32>} : memref<4x32xf32, #tpu.memory_space<vmem>>, vector<4x32xf32>,
    return
  }
  func.func @transform_0(%arg0: i32) -> (i32, i32) {
    %c0_i32 = arith.constant 0 : i32
    %c0_i32_0 = arith.constant 0 : i32
    return %c0_i32, %arg0 : i32, i32
  }
  func.func @transform_1(%arg0: i32) -> (i32, i32) {
    %c0_i32 = arith.constant 0 : i32
    %c0_i32_0 = arith.constant 0 : i32
    return %c0_i32, %arg0 : i32, i32
  }
  func.func @transform_2(%arg0: i32) -> (i32, i32) {
    %c0_i32 = arith.constant 0 : i32
    %c0_i32_0 = arith.constant 0 : i32
    %c0_i32_1 = arith.constant 0 : i32
    return %c0_i32, %c0_i32_0 : i32, i32
  }
  func.func @transform_3(%arg0: i32) -> (i32, i32) {
    %c0_i32 = arith.constant 0 : i32
    %c0_i32_0 = arith.constant 0 : i32
    %c0_i32_1 = arith.constant 0 : i32
    return %c0_i32, %c0_i32_0 : i32, i32
  }
  func.func @transform_4(%arg0: i32) -> (i32, i32, i32) {
    %c0_i32 = arith.constant 0 : i32
    %c0_i32_0 = arith.constant 0 : i32
    %c0_i32_1 = arith.constant 0 : i32
    %c0_i32_2 = arith.constant 0 : i32
    return %c0_i32, %c0_i32_0, %c0_i32_1 : i32, i32, i32
  }
  func.func @transform_5(%arg0: i32) -> (i32, i32, i32) {
    %c0_i32 = arith.constant 0 : i32
    %c0_i32_0 = arith.constant 0 : i32
    %c0_i32_1 = arith.constant 0 : i32
    %c0_i32_2 = arith.constant 0 : i32
    return %c0_i32, %c0_i32_0, %c0_i32_1 : i32, i32, i32
  }
  func.func @transform_6(%arg0: i32) -> (i32, i32, i32) {
    %c0_i32 = arith.constant 0 : i32
    %c0_i32_0 = arith.constant 0 : i32
    %c0_i32_1 = arith.constant 0 : i32
    %c0_i32_2 = arith.constant 0 : i32
    return %c0_i32, %c0_i32_0, %c0_i32_1 : i32, i32, i32
  }
  func.func @transform_7(%arg0: i32) -> (i32, i32, i32) {
    %c0_i32 = arith.constant 0 : i32
    %c0_i32_0 = arith.constant 0 : i32
    %c0_i32_1 = arith.constant 0 : i32
    %c0_i32_2 = arith.constant 0 : i32
    return %c0_i32, %c0_i32_0, %c0_i32_1 : i32, i32, i32
  }
  func.func @transform_8(%arg0: i32) -> (i32, i32) {
    %c0_i32 = arith.constant 0 : i32
    %c0_i32_0 = arith.constant 0 : i32
    return %c0_i32, %arg0 : i32, i32
  }
}

</mosaic_0001>

<bundles_post_ra>
// kernel: tpu_custom_call.1
= control target key start
LH: loop header
LB: loop body
LE: loop exit
PB: predicated region body
PF: predicated region fallthrough
CT: control target
= control target key end

     0   :  { %vm43_vm0 = vcmask 1043456   ;;  %vm39_vm1 = vcmask 31744   ;;  %v769_v1 = vmov 0.0   ;;  %vm770_vm2 = vmmov 0   ;;  %s899_s0 = inlined_call_operand.vmem [shape: f32[4,32], index: 0, kind: input, shape index: {}]   ;;  %s900_s1 = inlined_call_operand.vmem [shape: f32[4,32], index: 1, kind: input, shape index: {}]   ;;  %s901_s2 = inlined_call_operand.vmem [shape: f32[4,4], index: 2, kind: input, shape index: {}]   ;;  %s902_s3 = inlined_call_operand.vmem [shape: f32[4,1], index: 3, kind: input, shape index: {}]   ;;  %s903_s4 = inlined_call_operand.vmem [shape: f32[3,4,4], index: 4, kind: input, shape index: {}]   ;;  %s904_s5 = inlined_call_operand.vmem [shape: f32[3,4,1], index: 5, kind: input, shape index: {}]   ;;  %s905_s6 = inlined_call_operand.vmem [shape: f32[3,4,4], index: 6, kind: input, shape index: {}]   ;;  %s906_s7 = inlined_call_operand.vmem [shape: f32[3,4,1], index: 7, kind: input, shape index: {}]   ;;  %s907_s8 = inlined_call_operand.hbm [shape: f32[4,32], index: 8, kind: output, shape index: {}]  }
   0x1   :  { %v31_v0 = vld [vmem:[%s900_s1] sm:$0xf]  ;;  %686 = vmatprep.subr.mxu0 %v769_v1  ;;  %688 = vmatprep.mubr.msk.f32.mxu0 %vm770_vm2, %v769_v1  ;;  %v771_v4 = vmov 0  }
   0x2   :  { %v32_v2 = vld [vmem:[%s901_s2] sm:$0xf]  ;;  %687 = vmatpush3.msk.msra.mxu0 %vm43_vm0, %v31_v0  ;;  %733 = vset.pattern.permute.xlu0 %v771_v4 }
   0x3   :  { %v33_v3 = vld [vmem:[%s902_s3] sm:$0xf]  ;;  %689 = vmatmul.mubr.msk.f32.vlgmr.msra.gmra.mrb[0].mxu0 %vm39_vm1, %v32_v2 }
   0x4   :  { %v201_v5 = vld [vmem:[%s906_s7] sm:$0xf]  ;;  %36 = vperm.xlu0 %733, %v33_v3  }
   0x5   :  { %13 = vsyncpa [#allocation3], 0  ;;  %v118_v6 = vld [vmem:[%s904_s5] sm:$0xf]  ;;  %734 = vset.pattern.permute.xlu1 %v771_v4  ;;  %691 = vmatprep.subr.mxu1 %v769_v1  ;;  %v656_v7 = vld [vmem:[%s904_s5 + $0x4] sm:$0xf] }
   0x6   :  { %204 = vperm.xlu1 %734, %v201_v5   ;;  %701 = vmatprep.subr.mxu0 %v769_v1  ;;  %v30_v8 = vld [vmem:[%s899_s0] sm:$0xf]  ;;  %v660_v9 = vld [vmem:[%s906_s7 + $0x4] sm:$0xf]  ;;  %v665_v12 = vld [vmem:[%s904_s5 + $0x8] sm:$0xf] }
   0x7   :  { %693 = vmatprep.mubr.msk.f32.mxu1 %vm770_vm2, %v769_v1  ;;  %703 = vmatprep.mubr.msk.f32.mxu0 %vm770_vm2, %v769_v1  ;;  %v117_v10 = vld [vmem:[%s903_s4] sm:$0xf]  ;;  %v655_v11 = vld [vmem:[%s903_s4 + $0x4] sm:$0xf]  ;;  %v669_v13 = vld [vmem:[%s906_s7 + $0x8] sm:$0xf] }
   0x8   :  { %121 = vperm.xlu0 %733, %v118_v6   ;;  %692 = vmatpush3.msk.msra.mxu1 %vm43_vm0, %v30_v8  ;;  %v200_v18 = vld [vmem:[%s905_s6] sm:$0xf]  ;;  %v659_v19 = vld [vmem:[%s905_s6 + $0x4] sm:$0xf]  ;;  %v664_v20 = vld [vmem:[%s903_s4 + $0x8] sm:$0xf] }
   0x9   :  { %702 = vmatpush3.msk.msra.mxu0 %vm43_vm0, %v30_v8  ;;  %696 = vmatprep.subr.mxu1 %v769_v1  ;;  %v668_v21 = vld [vmem:[%s905_s6 + $0x8] sm:$0xf]  ;;  %s772_s4 = smov [#allocation2]   ;;  %vm632_vm3 = vcmask 257024  }
   0xa   :  { %296 = vperm.xlu1 %734, %v656_v7   ;;  %706 = vmatprep.subr.mxu0 %v769_v1  ;;  %s640_s6 = sshll.u32 %s772_s4, 4  ;;  %s641_s6 = int_to_ptr.vmem [resolvable:$true] %s640_s6 }
   0xb   :  { %694 = vmatmul.mubr.msk.f32.vlgmr.msra.gmra.mrb[0].mxu1 %vm39_vm1, %v117_v10  ;;  %704 = vmatmul.mubr.msk.f32.vlgmr.msra.gmra.mrb[2].mxu0 %vm39_vm1, %v655_v11  ;;  %s745_s9 = scalar_lea.vmem %s641_s6, 64  ;;  %p750_p1 = scmp.lt.s32.totalorder %s641_s6, %s641_s6 }
   0xc   :  { %378 = vperm.xlu0 %733, %v660_v9   ;;  %698 = vmatprep.mubr.msk.f32.mxu1 %vm770_vm2, %v769_v1  ;;  %p746_p0 = scmp.ne.s32.totalorder %s641_s6, %s745_s9  ;;  %p751_p2 = scmp.lt.s32.totalorder %s745_s9, %s745_s9 }
   0xd   :  { %708 = vmatprep.mubr.msk.f32.mxu0 %vm770_vm2, %v769_v1 }
   0xe   :  { %549 = vperm.xlu1 %734, %v669_v13   ;;  %p752_p3 = por %p751_p2, %p750_p1 }
  0x10   :  { %467 = vperm.xlu0 %733, %v665_v12   ;;  %p753_p4 = pnand %p752_p3, %p746_p0 }
  0x83   :  { %v37_v14 = vpop.permute.xlu0 %36 }
  0x85   :  { %v205_v23 = vpop.permute.xlu1 %204 }
  0x87   :  { %v122_v22 = vpop.permute.xlu0 %121 }
  0x88   :  { %v721_v24 = vadd.f32 %v205_v23, %v122_v22 }
  0x89   :  { %v297_v26 = vpop.permute.xlu1 %296 }
  0x8b   :  { %v379_v25 = vpop.permute.xlu0 %378 }
  0x8c   :  { %v723_v32 = vadd.f32 %v379_v25, %v297_v26 }
  0x8d   :  { %v550_v44 = vpop.permute.xlu1 %549 }
  0x8f   :  { %v468_v47 = vpop.permute.xlu0 %467 }
  0xd6   :  { %v113_v15 = vpop.f32.mrb[0].mxu0 }
  0xd7   :  { %v114_v16 = vadd.f32 %v113_v15, %v37_v14  ;;  %v690_v17 = vpop.f32.mrb[1].mxu0 }
  0xd9   :  { %697 = vmatpush3.msk.msra.mxu1 %vm43_vm0, %v114_v16  ;;  %707 = vmatpush3.msk.msra.mxu0 %vm43_vm0, %v114_v16 }
  0xda   :  { %699 = vmatmul.mubr.msk.f32.vlgmr.msra.gmra.mrb[0].mxu1 %vm39_vm1, %v200_v18  ;;  %709 = vmatmul.mubr.msk.f32.vlgmr.msra.gmra.mrb[2].mxu0 %vm39_vm1, %v659_v19 }
  0xdb   :  { %716 = vmatprep.subr.mxu0 %v769_v1  ;;  %711 = vmatprep.subr.mxu1 %v769_v1 }
  0xdc   :  { %717 = vmatpush3.msk.msra.mxu0 %vm43_vm0, %v114_v16  ;;  %712 = vmatpush3.msk.msra.mxu1 %vm43_vm0, %v30_v8 }
  0xdd   :  { %713 = vmatprep.mubr.msk.f32.mxu1 %vm770_vm2, %v769_v1  ;;  %718 = vmatprep.mubr.msk.f32.mxu0 %vm770_vm2, %v769_v1 }
  0xde   :  { %714 = vmatmul.mubr.msk.f32.vlgmr.msra.gmra.mrb[2].mxu1 %vm39_vm1, %v664_v20  ;;  %719 = vmatmul.mubr.msk.f32.vlgmr.msra.gmra.mrb[4].mxu0 %vm39_vm1, %v668_v21 }
 0x1ad   :  { %v279_v27 = vpop.f32.mrb[0].mxu1  ;;  %v450_v28 = vpop.f32.mrb[2].mxu0 }
 0x1ae   :  { %v722_v29 = vadd.f32 %v721_v24, %v279_v27  ;;  %v700_v30 = vpop.f32.mrb[1].mxu1  ;;  %v710_v31 = vpop.f32.mrb[3].mxu0  ;;  %v724_v34 = vadd.f32 %v723_v32, %v450_v28 }
 0x1b0   :  { %v654_v33 = vmul.f32 -1.442695, %v722_v29  ;;  %v663_v39 = vmul.f32 -1.442695, %v724_v34 }
 0x1b1   :  { %v539_v35 = vpop.f32.mrb[2].mxu1  ;;  %v621_v36 = vpop.f32.mrb[4].mxu0 }
 0x1b2   :  { %735 = vpow2.f32 %v654_v33  ;;  %v720_v37 = vpop.f32.mrb[5].mxu0  ;;  %v715_v38 = vpop.f32.mrb[3].mxu1  ;;  %v622_v45 = vadd.f32 %v621_v36, %v550_v44  ;;  %v540_v48 = vadd.f32 %v539_v35, %v468_v47 }
 0x1b3   :  { %737 = vpow2.f32 %v663_v39 }
 0x1bc   :  { %v736_v40 = vpop.eup %735 }
 0x1bd   :  { %v287_v41 = vadd.f32 1.0, %v736_v40  ;;  %v738_v42 = vpop.eup %737 }
 0x1be   :  { %v458_v43 = vadd.f32 1.0, %v738_v42 }
 0x1bf   :  { %739 = vrcp.f32 %v287_v41 }
 0x1c0   :  { %741 = vrcp.f32 %v458_v43 }
 0x1c9   :  { %v740_v46 = vpop.eup %739 }
 0x1ca   :  { %v625_v49 = vmul.f32 %v740_v46, %v622_v45  ;;  %v742_v51 = vpop.eup %741 }
 0x1cb   :  { %v628_v52 = vsub.f32 1.0, %v742_v51  ;;  %v630_v55 = vmul.f32 %v742_v51, %v114_v16 }
 0x1cc   :  { %v626_v50 = vadd.f32 %v625_v49, %v540_v48 }
 0x1ce   :  { %743 = vtanh.f32 %v626_v50 }
 0x1d8   :  { %v744_v53 = vpop.eup %743 }
 0x1d9   :  { %v629_v54 = vmul.f32 %v744_v53, %v628_v52 }
 0x1db   :  { %v631_v56 = vadd.f32 %v630_v55, %v629_v54 }
 0x1dd   :  { %633 = vst.msk [vmem:[#allocation2] sm:$0xf] %vm632_vm3, %v631_v56 }
 0x1de   :  { %756 = shalt.err (!%p753_p4)
}
 0x1df   :  { %s757_s11 = scalar_lea.hbm %s907_s8, 64 }
 0x1e0   :  { %p758_p5 = scmp.ne.s32.totalorder %s907_s8, %s757_s11  ;;  %p761_p6 = scmp.lt.u32.totalorder %s757_s11, %s907_s8 }
 0x1e2   :  { %p763_p7 = pnand %p761_p6, %p758_p5 }
 0x1e4   :  { %766 = shalt.err (!%p763_p7)
}
 0x1e5   :  { %643 = dma.vmem_to_hbm [thread:$0]  %s641_s6, 64, %s907_s8, [#allocation3]  }
 0x1e6   :  { %767 = dma.done.wait [#allocation3], 64  }
 0x1e7   :  { %768 = vsyncadd [#allocation3], 4294967232 }
 0x1e8   :  { %647 = vsyncpa [#allocation3], 1 }

</bundles_post_ra>
